<compile_context>
chip_gen: v5e
topology: v5e:2x2
jax: 0.10.0
libtpu: 0.0.40
codegen_flags: <defaults>
</compile_context>

<pallas_src>
import functools

import jax
import jax.numpy as jnp
from jax.experimental import pallas as pl
from jax.experimental.pallas import tpu as pltpu


# ----------------------------- Pallas kernel ------------------------------- #
def _rope_kernel(fac_ref, q_ref, k_ref, qo_ref, ko_ref, *,
                 head_size, rotary_dim, num_q_heads, num_kv_heads,
                 is_neox_style, head_loop_threshold=16):
    half = rotary_dim // 2
    compute_dtype = jnp.float32   # f32 math even for bf16 q/k (HBM-bound slack)

    # Rotation factors (C with pass-through 1s, S with signs baked in), shared
    # by all heads and by q & k.  Cast once per tile.
    c = fac_ref[:, :head_size].astype(compute_dtype)        # (T, head_size)
    s = fac_ref[:, head_size:].astype(compute_dtype)        # (T, head_size)

    # Hoisted partner-selection mask (single iota + compare per tile).
    single_roll = is_neox_style and rotary_dim == head_size
    if not single_roll:
        lane = jax.lax.broadcasted_iota(jnp.int32, c.shape, 1)
        if is_neox_style:
            pick_fwd = lane < half                 # lanes pairing with j+half
            fwd_shift, bwd_shift = head_size - half, half
        else:
            pick_fwd = (lane & 1) == 0             # even lanes pair with j+1
            fwd_shift, bwd_shift = head_size - 1, 1

    def partner(xh):
        # xh: (T, head_size).  XLU rolls (free slot vs. VPU).
        if single_roll:
            return pltpu.roll(xh, shift=half, axis=1)
        fwd = pltpu.roll(xh, shift=fwd_shift, axis=1)        # x[j + d]
        bwd = pltpu.roll(xh, shift=bwd_shift, axis=1)        # x[j - d]
        return jnp.where(pick_fwd, fwd, bwd)

    def rotate(xh):
        # Pass-through lanes have C=1, S=0 baked into the factors.
        return xh * c + partner(xh) * s

    # TODO(synk): head_size not a multiple of 128 (64/80/96) hits misaligned
    # lane slices; pack two heads per 128-lane group in the wrapper for those.
    align = 128 if head_size % 128 == 0 else head_size

    def apply(x_ref, o_ref, n_heads):
        if n_heads >= head_loop_threshold:
            # Bounded live ranges / code size for large head counts.
            def body(h, carry):
                lo = pl.multiple_of(h * head_size, align)
                xh = x_ref[:, pl.ds(lo, head_size)].astype(compute_dtype)
                o_ref[:, pl.ds(lo, head_size)] = rotate(xh).astype(o_ref.dtype)
                return carry
            jax.lax.fori_loop(0, n_heads, body, 0, unroll=2)
        else:
            for h in range(n_heads):               # small head count: unroll
                lo = h * head_size
                xh = x_ref[:, lo:lo + head_size].astype(compute_dtype)
                o_ref[:, lo:lo + head_size] = rotate(xh).astype(o_ref.dtype)

    apply(q_ref, qo_ref, num_q_heads)
    apply(k_ref, ko_ref, num_kv_heads)


# --------------------------- tiling heuristics ------------------------------ #
def _tile_params():
    """Per-generation tiling knobs (TC count / physical VMEM aware)."""
    kind = ""
    try:
        kind = jax.devices()[0].device_kind.lower()
    except Exception:
        pass
    if "v7" in kind:
        # 2 TensorCores, 64 MiB VMEM per TC: keep several evenly sized grid
        # steps for balanced megacore sharding, cap scoped VMEM well below 64.
        return dict(vmem_budget=16 << 20, max_tile=1024, min_steps=4,
                    vmem_cap=40 << 20)
    if ("v6" in kind) or ("trillium" in kind) or ("v5" in kind):
        # 1 TensorCore, 128 MiB VMEM: big single tiles, no forced splitting.
        return dict(vmem_budget=28 << 20, max_tile=2048, min_steps=1,
                    vmem_cap=100 << 20)
    # Unknown / older generations: conservative.
    return dict(vmem_budget=16 << 20, max_tile=1024, min_steps=2,
                vmem_cap=40 << 20)


def _choose_tile_tokens(num_tokens, bytes_per_token, *, vmem_budget, max_tile,
                        min_steps, **_):
    """Largest token tile (multiple of 8) whose double-buffered working set
    fits the budget; optionally split into >= min_steps even grid steps."""
    n8 = ((num_tokens + 7) // 8) * 8
    tile = vmem_budget // (2 * max(int(bytes_per_token), 1))   # 2 = dbl-buffer
    tile = max(8, min(int(tile), int(max_tile), n8))
    if min_steps > 1 and n8 > 8:
        even = -(-n8 // min_steps)                  # ceil div
        even = max(8, ((even + 7) // 8) * 8)
        tile = min(tile, even)
    return max(8, (tile // 8) * 8)


# ------------------------------ Module port -------------------------------- #
class RotaryEmbedding:
    """JAX/Pallas port of DeFT RotaryEmbedding (forward_native semantics)."""

    def __init__(self, head_size, rotary_dim, max_position_embeddings, base,
                 is_neox_style, dtype):
        self.head_size = head_size
        self.rotary_dim = rotary_dim
        self.max_position_embeddings = max_position_embeddings
        self.base = base
        self.is_neox_style = is_neox_style
        self.dtype = dtype
        self.cos_sin_cache = self._compute_cos_sin_cache().astype(dtype)
        # Sign / interleave / pass-through layout baked once at init:
        # (max_pos, 2*head_size) = [C | S] per position.
        self._factor_cache = self._bake_factor_cache(self.cos_sin_cache)

    def _compute_inv_freq(self, base):
        exps = jnp.arange(0, self.rotary_dim, 2, dtype=jnp.float32) / self.rotary_dim
        return 1.0 / (base ** exps)

    def _compute_cos_sin_cache(self):
        inv_freq = self._compute_inv_freq(self.base)
        t = jnp.arange(self.max_position_embeddings, dtype=jnp.float32)
        freqs = jnp.einsum("i,j->ij", t, inv_freq)
        return jnp.concatenate([jnp.cos(freqs), jnp.sin(freqs)], axis=-1)

    def _bake_factor_cache(self, cache):
        n = cache.shape[0]
        half = self.rotary_dim // 2
        cos, sin = cache[:, :half], cache[:, half:]
        if self.is_neox_style:
            c = jnp.concatenate([cos, cos], axis=-1)                 # (n, rd)
            s = jnp.concatenate([-sin, sin], axis=-1)
        else:
            c = jnp.stack([cos, cos], axis=-1).reshape(n, self.rotary_dim)
            s = jnp.stack([-sin, sin], axis=-1).reshape(n, self.rotary_dim)
        if self.rotary_dim < self.head_size:                         # pass lanes
            pad = self.head_size - self.rotary_dim
            c = jnp.pad(c, ((0, 0), (0, pad)), constant_values=1)
            s = jnp.pad(s, ((0, 0), (0, pad)), constant_values=0)
        return jnp.concatenate([c, s], axis=-1)                      # (n, 2*hs)

    def __call__(self, positions, query, key, offsets=None, *,
                 tile_tokens=None, donate_qk=False):
        if offsets is not None:
            positions = positions + offsets
        positions = positions.reshape(-1)
        num_tokens = positions.shape[0]
        hs = self.head_size

        # Single gather of baked factors: (T, 2*head_size).
        # TODO(synk): optionally fuse this gather in-kernel via
        # PrefetchScalarGridSpec(num_scalar_prefetch=1) + pl.Element row gather.
        fac = jnp.take(self._factor_cache, positions, axis=0)

        q_shape, k_shape = query.shape, key.shape
        q2 = query.reshape(num_tokens, -1)          # lane-dense flat layout
        k2 = key.reshape(num_tokens, -1)
        hq = q2.shape[1] // hs
        hk = k2.shape[1] // hs
        assert hq * hs == q2.shape[1] and hk * hs == k2.shape[1]

        itemsize = jnp.dtype(query.dtype).itemsize
        fac_itemsize = jnp.dtype(fac.dtype).itemsize
        bytes_per_token = ((hq + hk) * hs * itemsize * 2      # q/k in + out
                           + 2 * hs * fac_itemsize)           # factor block
        params = _tile_params()
        if tile_tokens is None:
            tile_tokens = _choose_tile_tokens(num_tokens, bytes_per_token,
                                              **params)
        tile_tokens = max(8, (int(tile_tokens) // 8) * 8)

        # No pre-padding and no output slices: ragged last block is handled by
        # Pallas (reads of OOB rows are unspecified, writeback is masked).
        grid_len = int(pl.cdiv(num_tokens, tile_tokens))

        footprint = 2 * tile_tokens * bytes_per_token          # dbl-buffered
        vmem_limit = int(min(max(footprint + (8 << 20), 32 << 20),
                             params["vmem_cap"]))

        kernel = functools.partial(
            _rope_kernel, head_size=hs, rotary_dim=self.rotary_dim,
            num_q_heads=hq, num_kv_heads=hk, is_neox_style=self.is_neox_style)

        aliases = {1: 0, 2: 1} if donate_qk else {}

        q_out, k_out = pl.pallas_call(
            kernel,
            out_shape=(jax.ShapeDtypeStruct(q2.shape, q2.dtype),
                       jax.ShapeDtypeStruct(k2.shape, k2.dtype)),
            grid_spec=pltpu.PrefetchScalarGridSpec(
                num_scalar_prefetch=0,
                grid=(grid_len,),
                in_specs=[
                    pl.BlockSpec((tile_tokens, 2 * hs), lambda i: (i, 0)),
                    pl.BlockSpec((tile_tokens, hq * hs), lambda i: (i, 0)),
                    pl.BlockSpec((tile_tokens, hk * hs), lambda i: (i, 0)),
                ],
                out_specs=[
                    pl.BlockSpec((tile_tokens, hq * hs), lambda i: (i, 0)),
                    pl.BlockSpec((tile_tokens, hk * hs), lambda i: (i, 0)),
                ],
            ),
            compiler_params=pltpu.CompilerParams(
                dimension_semantics=("parallel",),
                vmem_limit_bytes=vmem_limit),
            input_output_aliases=aliases,
        )(fac, q2, k2)

        return q_out.reshape(q_shape), k_out.reshape(k_shape)


# --------------------------- pure-JAX reference ----------------------------- #
def _reference(rope, positions, query, key):
    positions = positions.reshape(-1)
    n = positions.shape[0]
    cs = jnp.take(rope.cos_sin_cache, positions, axis=0)
    half = rope.rotary_dim // 2
    cos, sin = cs[:, :half], cs[:, half:]

    def apply(x):
        shape = x.shape
        x = x.reshape(n, -1, rope.head_size)
        rot, pas = x[..., :rope.rotary_dim], x[..., rope.rotary_dim:]
        c = cos[:, None, :].astype(x.dtype)
        s = sin[:, None, :].astype(x.dtype)
        if rope.is_neox_style:
            x1, x2 = rot[..., :half], rot[..., half:]
            out = jnp.concatenate([x1 * c - x2 * s, x2 * c + x1 * s], axis=-1)
        else:
            x1, x2 = rot[..., ::2], rot[..., 1::2]
            out = jnp.stack([x1 * c - x2 * s, x2 * c + x1 * s],
                            axis=-1).reshape(rot.shape)
        return jnp.concatenate([out, pas], axis=-1).reshape(shape)

    return apply(query), apply(key)


if __name__ == "__main__":
    root = jax.random.PRNGKey(0)

    def run_case(case_key, *, head_size, rotary_dim, is_neox, num_tokens,
                 num_q_heads, num_kv_heads, max_pos=512):
        rope = RotaryEmbedding(head_size, rotary_dim, max_pos, 10000,
                               is_neox_style=is_neox, dtype=jnp.float32)
        kp, kq, kk = jax.random.split(case_key, 3)
        positions = jax.random.randint(kp, (num_tokens,), 0, max_pos,
                                       dtype=jnp.int32)
        query = jax.random.normal(kq, (num_tokens, num_q_heads * head_size),
                                  dtype=jnp.float32)
        keyt = jax.random.normal(kk, (num_tokens, num_kv_heads * head_size),
                                 dtype=jnp.float32)

        q_out, k_out = rope(positions, query, keyt)
        jax.block_until_ready((q_out, k_out))

        q_ref, k_ref = _reference(rope, positions, query, keyt)
        assert jnp.allclose(q_out, q_ref, atol=1e-5, rtol=1e-5)
        assert jnp.allclose(k_out, k_ref, atol=1e-5, rtol=1e-5)

    k1, k2, k3, k4 = jax.random.split(root, 4)
    # NeoX-style, full rotary (single-roll fast path).
    run_case(k1, head_size=128, rotary_dim=128, is_neox=True,
             num_tokens=16, num_q_heads=4, num_kv_heads=2)
    # GPT-J interleaved style + ragged token count (masked last block path).
    run_case(k2, head_size=128, rotary_dim=128, is_neox=False,
             num_tokens=20, num_q_heads=4, num_kv_heads=2)
    # Partial rotary (rotary_dim < head_size), NeoX style.
    run_case(k3, head_size=128, rotary_dim=64, is_neox=True,
             num_tokens=16, num_q_heads=4, num_kv_heads=2)
    # GPT-J + partial rotary, wider q (still static-unroll head path).
    run_case(k4, head_size=128, rotary_dim=64, is_neox=False,
             num_tokens=12, num_q_heads=8, num_kv_heads=4)

    print("KERNEL_OK")
</pallas_src>

<mosaic_0001>
module attributes {stable_mosaic.version = 11 : i64} {
  func.func @_rope_kernel(%arg0: i32, %arg1: memref<8x256xf32, #tpu.memory_space<vmem>>, %arg2: memref<8x512xf32, #tpu.memory_space<vmem>>, %arg3: memref<8x256xf32, #tpu.memory_space<vmem>>, %arg4: memref<8x512xf32, #tpu.memory_space<vmem>>, %arg5: memref<8x256xf32, #tpu.memory_space<vmem>>) attributes {dimension_semantics = [#tpu.dimension_semantics<parallel>], iteration_bounds = array<i64: 2>, scalar_prefetch = 0 : i64, scratch_operands = 0 : i64, tpu.core_type = #tpu.core_type<tc>, window_params = [{transform_indices = @transform_0, window_bounds = array<i64: 8, 256>}, {transform_indices = @transform_1, window_bounds = array<i64: 8, 512>}, {transform_indices = @transform_2, window_bounds = array<i64: 8, 256>}, {transform_indices = @transform_3, window_bounds = array<i64: 8, 512>}, {transform_indices = @transform_4, window_bounds = array<i64: 8, 256>}]} {
    %c0 = arith.constant 0 : index
    %c0_0 = arith.constant 0 : index
    %0 = vector.load %arg1[%c0, %c0_0] : memref<8x256xf32, #tpu.memory_space<vmem>>, vector<8x128xf32>
    %c0_1 = arith.constant 0 : index
    %c128 = arith.constant 128 : index
    %1 = vector.load %arg1[%c0_1, %c128] : memref<8x256xf32, #tpu.memory_space<vmem>>, vector<8x128xf32>
    %c0_2 = arith.constant 0 : index
    %c0_3 = arith.constant 0 : index
    %2 = vector.load %arg2[%c0_2, %c0_3] : memref<8x512xf32, #tpu.memory_space<vmem>>, vector<8x128xf32>
    %3 = arith.mulf %2, %0 : vector<8x128xf32>
    %c64_i32 = arith.constant 64 : i32
    %4 = tpu.dynamic_rotate %2 by %c64_i32 dim 1 : vector<8x128xf32>, i32 -> vector<8x128xf32>
    %5 = arith.mulf %4, %1 : vector<8x128xf32>
    %6 = arith.addf %3, %5 : vector<8x128xf32>
    %c0_4 = arith.constant 0 : index
    %c0_5 = arith.constant 0 : index
    %7 = vector.load %arg4[%c0_4, %c0_5] : memref<8x512xf32, #tpu.memory_space<vmem>>, vector<8x128xf32>
    tpu.vector_store %arg4[%c0_4, %c0_5], %6 {strides = array<i32>} : memref<8x512xf32, #tpu.memory_space<vmem>>, vector<8x128xf32>,
    %c0_6 = arith.constant 0 : index
    %c128_7 = arith.constant 128 : index
    %8 = vector.load %arg2[%c0_6, %c128_7] : memref<8x512xf32, #tpu.memory_space<vmem>>, vector<8x128xf32>
    %9 = arith.mulf %8, %0 : vector<8x128xf32>
    %c64_i32_8 = arith.constant 64 : i32
    %10 = tpu.dynamic_rotate %8 by %c64_i32_8 dim 1 : vector<8x128xf32>, i32 -> vector<8x128xf32>
    %11 = arith.mulf %10, %1 : vector<8x128xf32>
    %12 = arith.addf %9, %11 : vector<8x128xf32>
    %c0_9 = arith.constant 0 : index
    %c128_10 = arith.constant 128 : index
    %13 = vector.load %arg4[%c0_9, %c128_10] : memref<8x512xf32, #tpu.memory_space<vmem>>, vector<8x128xf32>
    tpu.vector_store %arg4[%c0_9, %c128_10], %12 {strides = array<i32>} : memref<8x512xf32, #tpu.memory_space<vmem>>, vector<8x128xf32>,
    %c0_11 = arith.constant 0 : index
    %c256 = arith.constant 256 : index
    %14 = vector.load %arg2[%c0_11, %c256] : memref<8x512xf32, #tpu.memory_space<vmem>>, vector<8x128xf32>
    %15 = arith.mulf %14, %0 : vector<8x128xf32>
    %c64_i32_12 = arith.constant 64 : i32
    %16 = tpu.dynamic_rotate %14 by %c64_i32_12 dim 1 : vector<8x128xf32>, i32 -> vector<8x128xf32>
    %17 = arith.mulf %16, %1 : vector<8x128xf32>
    %18 = arith.addf %15, %17 : vector<8x128xf32>
    %c0_13 = arith.constant 0 : index
    %c256_14 = arith.constant 256 : index
    %19 = vector.load %arg4[%c0_13, %c256_14] : memref<8x512xf32, #tpu.memory_space<vmem>>, vector<8x128xf32>
    tpu.vector_store %arg4[%c0_13, %c256_14], %18 {strides = array<i32>} : memref<8x512xf32, #tpu.memory_space<vmem>>, vector<8x128xf32>,
    %c0_15 = arith.constant 0 : index
    %c384 = arith.constant 384 : index
    %20 = vector.load %arg2[%c0_15, %c384] : memref<8x512xf32, #tpu.memory_space<vmem>>, vector<8x128xf32>
    %21 = arith.mulf %20, %0 : vector<8x128xf32>
    %c64_i32_16 = arith.constant 64 : i32
    %22 = tpu.dynamic_rotate %20 by %c64_i32_16 dim 1 : vector<8x128xf32>, i32 -> vector<8x128xf32>
    %23 = arith.mulf %22, %1 : vector<8x128xf32>
    %24 = arith.addf %21, %23 : vector<8x128xf32>
    %c0_17 = arith.constant 0 : index
    %c384_18 = arith.constant 384 : index
    %25 = vector.load %arg4[%c0_17, %c384_18] : memref<8x512xf32, #tpu.memory_space<vmem>>, vector<8x128xf32>
    tpu.vector_store %arg4[%c0_17, %c384_18], %24 {strides = array<i32>} : memref<8x512xf32, #tpu.memory_space<vmem>>, vector<8x128xf32>,
    %c0_19 = arith.constant 0 : index
    %c0_20 = arith.constant 0 : index
    %26 = vector.load %arg3[%c0_19, %c0_20] : memref<8x256xf32, #tpu.memory_space<vmem>>, vector<8x128xf32>
    %27 = arith.mulf %26, %0 : vector<8x128xf32>
    %c64_i32_21 = arith.constant 64 : i32
    %28 = tpu.dynamic_rotate %26 by %c64_i32_21 dim 1 : vector<8x128xf32>, i32 -> vector<8x128xf32>
    %29 = arith.mulf %28, %1 : vector<8x128xf32>
    %30 = arith.addf %27, %29 : vector<8x128xf32>
    %c0_22 = arith.constant 0 : index
    %c0_23 = arith.constant 0 : index
    %31 = vector.load %arg5[%c0_22, %c0_23] : memref<8x256xf32, #tpu.memory_space<vmem>>, vector<8x128xf32>
    tpu.vector_store %arg5[%c0_22, %c0_23], %30 {strides = array<i32>} : memref<8x256xf32, #tpu.memory_space<vmem>>, vector<8x128xf32>,
    %c0_24 = arith.constant 0 : index
    %c128_25 = arith.constant 128 : index
    %32 = vector.load %arg3[%c0_24, %c128_25] : memref<8x256xf32, #tpu.memory_space<vmem>>, vector<8x128xf32>
    %33 = arith.mulf %32, %0 : vector<8x128xf32>
    %c64_i32_26 = arith.constant 64 : i32
    %34 = tpu.dynamic_rotate %32 by %c64_i32_26 dim 1 : vector<8x128xf32>, i32 -> vector<8x128xf32>
    %35 = arith.mulf %34, %1 : vector<8x128xf32>
    %36 = arith.addf %33, %35 : vector<8x128xf32>
    %c0_27 = arith.constant 0 : index
    %c128_28 = arith.constant 128 : index
    %37 = vector.load %arg5[%c0_27, %c128_28] : memref<8x256xf32, #tpu.memory_space<vmem>>, vector<8x128xf32>
    tpu.vector_store %arg5[%c0_27, %c128_28], %36 {strides = array<i32>} : memref<8x256xf32, #tpu.memory_space<vmem>>, vector<8x128xf32>,
    return
  }
  func.func @transform_0(%arg0: i32) -> (i32, i32) {
    %c0_i32 = arith.constant 0 : i32
    %c0_i32_0 = arith.constant 0 : i32
    return %arg0, %c0_i32 : i32, i32
  }
  func.func @transform_1(%arg0: i32) -> (i32, i32) {
    %c0_i32 = arith.constant 0 : i32
    %c0_i32_0 = arith.constant 0 : i32
    return %arg0, %c0_i32 : i32, i32
  }
  func.func @transform_2(%arg0: i32) -> (i32, i32) {
    %c0_i32 = arith.constant 0 : i32
    %c0_i32_0 = arith.constant 0 : i32
    return %arg0, %c0_i32 : i32, i32
  }
  func.func @transform_3(%arg0: i32) -> (i32, i32) {
    %c0_i32 = arith.constant 0 : i32
    %c0_i32_0 = arith.constant 0 : i32
    return %arg0, %c0_i32 : i32, i32
  }
  func.func @transform_4(%arg0: i32) -> (i32, i32) {
    %c0_i32 = arith.constant 0 : i32
    %c0_i32_0 = arith.constant 0 : i32
    return %arg0, %c0_i32 : i32, i32
  }
}

</mosaic_0001>

<bundles_post_ra>
// kernel: tpu_custom_call.1
= control target key start
LH: loop header
LB: loop body
LE: loop exit
PB: predicated region body
PF: predicated region fallthrough
CT: control target
= control target key end

     0   :  { %s1041_s0 = inlined_call_operand.hbm [shape: f32[16,256], index: 0, kind: input, shape index: {}]   ;;  %s1042_s1 = inlined_call_operand.hbm [shape: f32[16,512], index: 1, kind: input, shape index: {}]   ;;  %s1043_s2 = inlined_call_operand.hbm [shape: f32[16,256], index: 2, kind: input, shape index: {}]   ;;  %s1044_s3 = inlined_call_operand.hbm [shape: f32[16,512], index: 3, kind: output, shape index: {0}]   ;;  %s1045_s4 = inlined_call_operand.hbm [shape: f32[16,256], index: 4, kind: output, shape index: {1}]  }
   0x1   :  { %1049 = sst [smem:[#allocation18_spill]] %s1042_s1 }
   0x2   :  { %10 = vsyncpa [#allocation3], 0 }
   0x3   :  { %12 = vsyncpa [#allocation3 + $0x1], 0 }
   0x4   :  { %13 = vsyncpa [#allocation6], 0 }
   0x5   :  { %15 = vsyncpa [#allocation6 + $0x1], 0 }
   0x6   :  { %16 = vsyncpa [#allocation4], 0 }
   0x7   :  { %18 = vsyncpa [#allocation4 + $0x1], 0 }
   0x8   :  { %19 = vsyncpa [#allocation10], 0 }
   0x9   :  { %21 = vsyncpa [#allocation10 + $0x1], 0  ;;  %s844_s15 = smov 0   ;;  %s846_s16 = smov 0  }
   0xa   :  { %s848_s17 = smov 0   ;;  %s850_s18 = smov 0  }
   0xb LB: > { %1050 = sst [smem:[#allocation15_spill]] %s812_s17  ;;  %s865_s19 = sadd.s32 4294967295, %s816_s18   ;;  %s816_s18 = sphi %s850_s18, %s1059_s18   ;;  %s812_s17 = sphi %s848_s17, %s1061_s17   ;;  %s808_s16 = sphi %s846_s16, %s1063_s16   ;;  %s804_s15 = sphi %s844_s15, %s1062_s15  }
   0xc   : > { %s531_s20 = sadd.s32 4294967294, %s816_s18   ;;  %s869_s21 = sadd.s32 1, %s816_s18  }
   0xd   : > { %1051 = sst [smem:[#allocation16_spill]] %s869_s21  ;;  %s34_s22 = sadd.s32 1, %s812_s17 }
   0xe   : > { %s31_s23 = ssub.s32 %s816_s18, %s869_s21  ;;  %p41_p0 = scmp.ne.s32.totalorder %s812_s17, %s808_s16 }
   0xf   : > { %p32_p1 = scmp.eq.s32.totalorder %s31_s23, 0  ;;  %p42_p2 = scmp.eq.s32.totalorder %s816_s18, 0 }
  0x10   : > { %p47_p3 = scmp.ne.s32.totalorder %s808_s16, %s804_s15  ;;  %p48_p4 = scmp.eq.s32.totalorder %s865_s19, 0 }
  0x11   : > { %s881_s24 = scalar_select %p32_p1, %s812_s17, %s34_s22  }
  0x12   : > { %p43_p5 = por %p42_p2, %p41_p0  ;;  %p883_p6 = por %p48_p4, %p47_p3 }
  0x13   : > { %1052 = sst [smem:[#allocation17_spill]] %s881_s24  ;;  %p123_p7 = scmp.eq.s32.totalorder %s865_s19, 1 }
  0x14   : > { %p129_p8 = scmp.eq.s32.totalorder %s531_s20, 1  ;;  %p533_p9 = scmp.ge.s32.totalorder %s816_s18, 2 }
  0x15   : > { %p589_p10 = scmp.lt.s32.totalorder %s816_s18, 2  ;;  %p890_p11 = por %p123_p7, %p41_p0 }
  0x16   : > { %p894_p12 = por %p129_p8, %p47_p3  ;;  %s899_s28 = sand.u32 1, %s812_s17  }
  0x17   : > { %p901_p13 = pnand %p589_p10, %p43_p5  ;;  %s195_s30 = sand.u32 1, %s816_s18  }
  0x18   : > { %s537_s5 = sshll.u32 %s899_s28, 5  ;;  %s558_s6 = sshll.u32 %s816_s18, 5 }
  0x19   : > { %s1057_s1 = sld [smem:[#allocation18_spill]]  ;;  %s199_s10 = scalar_lea.vmem [#allocation5], %s537_s5 }
  0x1a   : > { %s208_s11 = sshll.u32 %s199_s10, 4  ;;  %p543_p0 = scmp.ge.s32.totalorder %s816_s18, 1  ;;  %s209_s11 = int_to_ptr.vmem [resolvable:$true] %s208_s11 }
  0x1b   : > { %s912_s13 = scalar_lea.sflag [#allocation6], %s195_s30  ;;  %p628_p2 = pneg %p901_p13 }
  0x1f   : > { %s204_s9 = scalar_lea.hbm %s1057_s1, %s558_s6  ;;  %s631_s5 = scalar_lea.hbm %s1057_s1, 64 }
  0x20   : > { %s206_s12 = sshll.u32 %s204_s9, 4  ;;  %s207_s12 = int_to_ptr.hbm [resolvable:$true] %s206_s12 }
  0x21   : > { %s624_s14 = sshra.s32 %s207_s12, 4  ;;  %s625_s14 = int_to_ptr.hbm [resolvable:$true] %s624_s14 }
  0x22   : > { %s626_s20 = scalar_lea.hbm %s625_s14, 32  ;;  %p632_p5 = scmp.lt.s32.totalorder %s625_s14, %s1057_s1 }
  0x23   : > { %p627_p1 = scmp.ne.s32.totalorder %s625_s14, %s626_s20  ;;  %p633_p7 = scmp.lt.s32.totalorder %s631_s5, %s626_s20 }
  0x25   : > { %p629_p3 = pnand %p628_p2, %p627_p1  ;;  %p634_p8 = por %p633_p7, %p632_p5 }
  0x27   : > { %p630_p4 = pneg %p629_p3 }
  0x29   : > { %p635_p10 = pnand %p634_p8, %p630_p4 }
  0x2b   : > { %638 = shalt.err (!%p635_p10)
}
  0x2c   : > { %578 = dma.hbm_to_vmem [thread:$0]  (!%p901_p13), %s207_s12, 512, %s209_s11, %s912_s13  }
  0x2d   : > { %p233_p1 = scmp.lt.s32.totalorder %s816_s18, 3  ;;  %s534_s30 = sshll.u32 %s899_s28, 4 }
  0x2e   : > { %s557_s8 = sshll.u32 %s816_s18, 4  ;;  %s179_s22 = scalar_lea.vmem [#allocation2], %s534_s30 }
  0x2f   : > { %p933_p3 = pnand %p543_p0, %p233_p1  ;;  %s184_s20 = scalar_lea.hbm %s1041_s0, %s557_s8 }
  0x30   : > { %s188_s23 = sshll.u32 %s179_s22, 4  ;;  %s186_s5 = sshll.u32 %s184_s20, 4  ;;  %s189_s23 = int_to_ptr.vmem [resolvable:$true] %s188_s23  ;;  %s187_s5 = int_to_ptr.hbm [resolvable:$true] %s186_s5 }
  0x31   : > { %s176_s6 = scalar_lea.sflag [#allocation3], %s899_s28  ;;  %s654_s11 = sshra.s32 %s187_s5, 4  ;;  %s655_s11 = int_to_ptr.hbm [resolvable:$true] %s654_s11 }
  0x32   : > { %s656_s12 = scalar_lea.hbm %s655_s11, 16  ;;  %s661_s24 = scalar_lea.hbm %s1041_s0, 32 }
  0x33   : > { %p657_p4 = scmp.ne.s32.totalorder %s655_s11, %s656_s12  ;;  %p662_p7 = scmp.lt.s32.totalorder %s655_s11, %s1041_s0 }
  0x34   : > { %p663_p8 = scmp.lt.s32.totalorder %s661_s24, %s656_s12 }
  0x35   : > { %p659_p0 = pnand %p657_p4, %p628_p2 }
  0x36   : > { %p664_p10 = por %p663_p8, %p662_p7 }
  0x37   : > { %p660_p5 = pneg %p659_p0 }
  0x39   : > { %p665_p1 = pnand %p664_p10, %p660_p5 }
  0x3b   : > { %668 = shalt.err (!%p665_p1)
}
  0x3c   : > { %575 = dma.hbm_to_vmem [thread:$0]  (!%p901_p13), %s187_s5, 256, %s189_s23, %s176_s6  }
  0x3d   : > { %s224_s22 = scalar_lea.hbm %s1043_s2, %s557_s8  ;;  %s219_s17 = scalar_lea.vmem [#allocation7], %s534_s30 }
  0x3e   : > { %s228_s21 = sshll.u32 %s219_s17, 4  ;;  %s226_s1 = sshll.u32 %s224_s22, 4  ;;  %s229_s21 = int_to_ptr.vmem [resolvable:$true] %s228_s21  ;;  %s227_s1 = int_to_ptr.hbm [resolvable:$true] %s226_s1 }
  0x3f   : > { %s684_s7 = sshra.s32 %s227_s1, 4  ;;  %s691_s23 = scalar_lea.hbm %s1043_s2, 32  ;;  %s685_s7 = int_to_ptr.hbm [resolvable:$true] %s684_s7 }
  0x40   : > { %s686_s11 = scalar_lea.hbm %s685_s7, 16  ;;  %p692_p7 = scmp.lt.s32.totalorder %s685_s7, %s1043_s2 }
  0x41   : > { %p687_p4 = scmp.ne.s32.totalorder %s685_s7, %s686_s11  ;;  %p693_p8 = scmp.lt.s32.totalorder %s691_s23, %s686_s11 }
  0x43   : > { %p689_p0 = pnand %p687_p4, %p628_p2  ;;  %p694_p10 = por %p693_p8, %p692_p7 }
  0x45   : > { %p690_p5 = pneg %p689_p0 }
  0x47   : > { %p695_p1 = pnand %p694_p10, %p690_p5 }
  0x49   : > { %698 = shalt.err (!%p695_p1)
}
  0x4a   : > { %581 = dma.hbm_to_vmem [thread:$0]  (!%p901_p13), %s227_s1, 256, %s229_s21, %s912_s13  }
  0x4b   : > { %237 = sbr.rel (%p933_p3) target bundleno = 216 (0xd8), region = 32  ;;  %s970_s17 = sand.u32 (!%p933_p3), 1, %s808_s16  }
  0x4c   : > { %s973_s30 = sshll.u32 (!%p933_p3), %s970_s17, 4  ;;  %s240_s8 = scalar_lea.sflag (!%p933_p3), [#allocation3], %s970_s17 }
  0x4d   : > { %s243_s10 = scalar_lea.vmem (!%p933_p3), [#allocation2], %s973_s30 }
  0x50   : > { %787 = dma.done.wait (%p883_p6), %s240_s8, 256  }
  0x51   : > { %789 = vsyncadd (%p883_p6), %s240_s8, 4294967040  ;;  %s249_s21 = sand.u32 1, %s865_s19   ;;  %s545_s29 = sshll.u32 %s970_s17, 5 }
  0x52   : > { %s250_s13 = scalar_lea.sflag [#allocation6], %s249_s21  ;;  %s253_s9 = scalar_lea.vmem [#allocation5], %s545_s29 }
  0x53   : > { %791 = dma.done.wait (%p883_p6), %s250_s13, 768  }
  0x54   : > { %793 = vsyncadd (%p883_p6), %s250_s13, 4294966528  ;;  %v320_v0 = vld [vmem:[%s253_s9 + $0x10] sm:$0xff]  ;;  %v306_v1 = vld [vmem:[%s253_s9] sm:$0xff]  ;;  %s818_s14 = smov 64   ;;  %s263_s28 = scalar_lea.vmem [#allocation7], %s973_s30 }
  0x55   : > { %322 = vrot.lane.b32.xlu1 %v320_v0, %s818_s14  ;;  %308 = vrot.lane.b32.xlu0 %v306_v1, %s818_s14  ;;  %v334_v2 = vld [vmem:[%s263_s28] sm:$0xff]  ;;  %v327_v3 = vld [vmem:[%s253_s9 + $0x18] sm:$0xff]  ;;  %s561_s25 = sshll.u32 %s865_s19, 4  ;;  %s303_s20 = scalar_lea.vmem [#allocation9], %s973_s30 }
  0x56   : > { %336 = vrot.lane.b32.xlu2 %v334_v2, %s818_s14  ;;  %v313_v4 = vld [vmem:[%s253_s9 + $0x8] sm:$0xff]  ;;  %v304_v6 = vld [vmem:[%s243_s10] sm:$0xff]  ;;  %s380_s7 = scalar_lea.hbm %s1045_s4, %s561_s25  ;;  %s382_s11 = sshll.u32 %s303_s20, 4  ;;  %s383_s11 = int_to_ptr.vmem [resolvable:$true] %s382_s11 }
  0x57   : > { %v341_v5 = vld [vmem:[%s263_s28 + $0x8] sm:$0xff]  ;;  %v335_v8 = vmul.f32 %v334_v2, %v304_v6  ;;  %s384_s24 = sshll.u32 %s380_s7, 4  ;;  %s354_s12 = scalar_lea.sflag [#allocation10], %s970_s17  ;;  %s385_s24 = int_to_ptr.hbm [resolvable:$true] %s384_s24 }
  0x58   : > { %v305_v7 = vld [vmem:[%s243_s10 + $0x8] sm:$0xff]  ;;  %v342_v12 = vmul.f32 %v341_v5, %v304_v6  ;;  %s728_s23 = sshra.s32 %s385_s24, 4  ;;  %s734_s8 = scalar_lea.hbm %s1045_s4, 32  ;;  %s729_s23 = int_to_ptr.hbm [resolvable:$true] %s728_s23 }
  0x59   : > { %s730_s5 = scalar_lea.hbm %s729_s23, 16  ;;  %p735_p3 = scmp.lt.s32.totalorder %s729_s23, %s1045_s4 }
  0x5a   : > { %p731_p6 = scmp.ne.s32.totalorder %s729_s23, %s730_s5  ;;  %p736_p4 = scmp.lt.s32.totalorder %s734_s8, %s730_s5 }
  0x5c   : > { %p732_p13 = pnand %p731_p6, %p890_p11  ;;  %p737_p0 = por %p736_p4, %p735_p3 }
  0x5d   : > { %329 = vrot.lane.b32.xlu1 %v327_v3, %s818_s14  ;;  %315 = vrot.lane.b32.xlu0 %v313_v4, %s818_s14 }
  0x5e   : > { %343 = vrot.lane.b32.xlu2 %v341_v5, %s818_s14  ;;  %p733_p2 = pneg %p732_p13 }
  0x60   : > { %p738_p5 = pnand %p737_p0, %p733_p2 }
  0xb0   : > { %v337_v9 = vpop.permute.xlu2 %336 }
  0xb1   : > { %v338_v10 = vmul.f32 %v337_v9, %v305_v7 }
  0xb3   : > { %v339_v11 = vadd.f32 %v338_v10, %v335_v8 }
  0xb5   : > { %340 = vst [vmem:[%s303_s20] sm:$0xff] %v339_v11 }
  0xb8   : > { %v344_v13 = vpop.permute.xlu2 %343 }
  0xb9   : > { %v345_v14 = vmul.f32 %v344_v13, %v305_v7 }
  0xbb   : > { %v346_v15 = vadd.f32 %v345_v14, %v342_v12 }
  0xbd   : > { %347 = vst [vmem:[%s303_s20 + $0x8] sm:$0xff] %v346_v15 }
  0xbe   : > { %741 = shalt.err (!%p738_p5)
}
  0xbf   : > { %569 = dma.vmem_to_hbm [thread:$0]  (%p890_p11), %s383_s11, 256, %s385_s24, %s354_s12   ;;  %v321_v16 = vmul.f32 %v320_v0, %v304_v6  ;;  %v307_v17 = vmul.f32 %v306_v1, %v304_v6  ;;  %v328_v24 = vmul.f32 %v327_v3, %v304_v6  ;;  %v314_v25 = vmul.f32 %v313_v4, %v304_v6 }
  0xc0   : > { %s560_s13 = sshll.u32 %s865_s19, 5  ;;  %s296_s9 = scalar_lea.vmem [#allocation8], %s545_s29 }
  0xc1   : > { %s365_s25 = scalar_lea.hbm %s1044_s3, %s560_s13  ;;  %s367_s20 = sshll.u32 %s296_s9, 4  ;;  %s368_s20 = int_to_ptr.vmem [resolvable:$true] %s367_s20 }
  0xc2   : > { %s369_s22 = sshll.u32 %s365_s25, 4  ;;  %s349_s19 = scalar_lea.sflag [#allocation4], %s970_s17  ;;  %s370_s22 = int_to_ptr.hbm [resolvable:$true] %s369_s22 }
  0xc3   : > { %s756_s29 = sshra.s32 %s370_s22, 4  ;;  %s762_s24 = scalar_lea.hbm %s1044_s3, 64  ;;  %s757_s29 = int_to_ptr.hbm [resolvable:$true] %s756_s29 }
  0xc4   : > { %s758_s1 = scalar_lea.hbm %s757_s29, 32  ;;  %p763_p1 = scmp.lt.s32.totalorder %s757_s29, %s1044_s3 }
  0xc5   : > { %p759_p7 = scmp.ne.s32.totalorder %s757_s29, %s758_s1  ;;  %p764_p6 = scmp.lt.s32.totalorder %s762_s24, %s758_s1 }
  0xc7   : > { %v323_v18 = vpop.permute.xlu1 %322  ;;  %v309_v19 = vpop.permute.xlu0 %308  ;;  %p760_p8 = pnand %p759_p7, %p890_p11  ;;  %p765_p13 = por %p764_p6, %p763_p1 }
  0xc8   : > { %v324_v20 = vmul.f32 %v323_v18, %v305_v7  ;;  %v310_v21 = vmul.f32 %v309_v19, %v305_v7 }
  0xc9   : > { %p761_p10 = pneg %p760_p8 }
  0xca   : > { %v325_v22 = vadd.f32 %v324_v20, %v321_v16  ;;  %v311_v23 = vadd.f32 %v310_v21, %v307_v17 }
  0xcb   : > { %p766_p2 = pnand %p765_p13, %p761_p10 }
  0xcc   : > { %326 = vst [vmem:[%s296_s9 + $0x10] sm:$0xff] %v325_v22 }
  0xcd   : > { %312 = vst [vmem:[%s296_s9] sm:$0xff] %v311_v23 }
  0xcf   : > { %v330_v26 = vpop.permute.xlu1 %329  ;;  %v316_v27 = vpop.permute.xlu0 %315 }
  0xd0   : > { %v331_v28 = vmul.f32 %v330_v26, %v305_v7  ;;  %v317_v29 = vmul.f32 %v316_v27, %v305_v7 }
  0xd2   : > { %v332_v30 = vadd.f32 %v331_v28, %v328_v24  ;;  %v318_v31 = vadd.f32 %v317_v29, %v314_v25 }
  0xd4   : > { %333 = vst [vmem:[%s296_s9 + $0x18] sm:$0xff] %v332_v30 }
  0xd5   : > { %319 = vst [vmem:[%s296_s9 + $0x8] sm:$0xff] %v318_v31 }
  0xd6   : > { %769 = shalt.err (!%p766_p2)
}
  0xd7   : > { %568 = dma.vmem_to_hbm [thread:$0]  (%p890_p11), %s368_s20, 512, %s370_s22, %s349_s19  }
  0xd8 PF: > { %s396_s17 = sand.u32 1, %s804_s15   ;;  %p583_p3 = pnand %p533_p9, %p894_p12 }
  0xd9   : > { %s397_s5 = scalar_lea.sflag [#allocation4], %s396_s17 }
  0xda   : > { %p584_p4 = pneg %p583_p3 }
  0xdc   : > { %795 = dma.done.wait (%p584_p4), %s397_s5, 512  }
  0xdd   : > { %797 = vsyncadd (%p584_p4), %s397_s5, 4294966784  ;;  %s407_s6 = scalar_lea.sflag [#allocation10], %s396_s17 }
  0xde   : > { %799 = dma.done.wait (%p584_p4), %s407_s6, 256  }
  0xdf   : > { %801 = vsyncadd (%p584_p4), %s407_s6, 4294967040  ;;  %s1059_s18 = sld [smem:[#allocation16_spill]]  ;;  %s1062_s15 = smov %s808_s16 }
  0xe0   : > { %s1060_s30 = sld [smem:[#allocation15_spill]] }
  0xe1   : > { %s1061_s17 = sld [smem:[#allocation17_spill]] }
  0xe5   : > { %p24_p11 = scmp.ge.s32.totalorder %s1059_s18, 4  }
  0xe6   : > { %s1063_s16 = smov %s1060_s30 }
  0xe7   :  { %26 = sbr.rel (!%p24_p11) target bundleno = 11 (0xb), region = 118 }
  0xec   :  { %413 = vsyncpa [#allocation3], 1 }
  0xed   :  { %415 = vsyncpa [#allocation3 + $0x1], 1 }
  0xee   :  { %416 = vsyncpa [#allocation6], 1 }
  0xef   :  { %418 = vsyncpa [#allocation6 + $0x1], 1 }
  0xf0   :  { %419 = vsyncpa [#allocation4], 1 }
  0xf1   :  { %421 = vsyncpa [#allocation4 + $0x1], 1 }
  0xf2   :  { %422 = vsyncpa [#allocation10], 1 }
  0xf3   :  { %424 = vsyncpa [#allocation10 + $0x1], 1 }

</bundles_post_ra>
